<compile_context>
chip_gen: v5e
topology: v5e:2x2
jax: 0.10.0
libtpu: 0.0.40
codegen_flags: <defaults>
</compile_context>

<pallas_src>
import jax
import jax.numpy as jnp
from jax import lax
from jax.experimental import pallas as pl
from jax.experimental.pallas import tpu as pltpu

N_OBSERVATIONS = 6
N_ACTIONS = 1
HIDDEN = 128


def _round_up(n, m):
    return ((n + m - 1) // m) * m


def dqn_kernel(x_ref, w1_ref, b1_ref, w2_ref, b2_ref, w3_ref, b3_ref, o_ref):
    # x_ref:  (TB, N_OBSERVATIONS) f32   batch-major, straight from the caller
    # w1_ref: (HIDDEN, N_OBSERVATIONS) f32
    # b1_ref: (HIDDEN, 1) f32
    # w2_ref: (HIDDEN, HIDDEN) bf16      stored (out, in)
    # b2_ref: (HIDDEN, 1) f32
    # w3_ref: (HIDDEN, N_ACTIONS) f32
    # b3_ref: (1, 1) f32
    # o_ref:  (N_ACTIONS, TB) f32        lane-dense output tile
    x = x_ref[...]                                         # (TB, OBS)

    # ---- Layer 1: Linear(6, 128) + ReLU on the MXU ------------------------------
    # Contract the OBS dim of both operands: (H, OBS) . (TB, OBS) -> (H, TB).
    # K = 6 is zero-padded by the hardware; keeps activations batch-on-lanes.
    h1 = lax.dot_general(
        w1_ref[...], x,
        dimension_numbers=(((1,), (1,)), ((), ())),
        preferred_element_type=jnp.float32) + b1_ref[...]  # (H, TB)
    h1 = jnp.maximum(h1, 0.0)

    # ---- Layer 2: Linear(128, 128) + ReLU (MXU, bf16 in / f32 accumulate) -------
    h2 = jnp.dot(w2_ref[...], h1.astype(jnp.bfloat16),
                 preferred_element_type=jnp.float32) + b2_ref[...]
    h2 = jnp.maximum(h2, 0.0)                               # (H, TB)

    # ---- Layer 3: Linear(128, 1) as VPU multiply + sublane reduce ----------------
    # N = 1 on the MXU would yield a lane-sparse result; this keeps batch on lanes
    # and the final store lane-dense.
    out = jnp.sum(w3_ref[...] * h2, axis=0, keepdims=True) + b3_ref[...]  # (1, TB)
    o_ref[...] = out.astype(o_ref.dtype)


def _choose_tiles(B, block_b):
    # Waste-bounded tile selection (perf review): pick the number of tiles first,
    # then the smallest 128-aligned tile that covers B with that many tiles.
    num_tiles = pl.cdiv(B, block_b)
    # v7x megacore: make sure there are >= 2 grid steps to shard when batch allows.
    if num_tiles == 1 and B >= 256:
        num_tiles = 2
    tb = _round_up(pl.cdiv(B, num_tiles), 128)
    return num_tiles, tb, num_tiles * tb


def dqn_forward(x, params, *, block_b=8192):
    """x: (B, N_OBSERVATIONS) f32 -> (B, N_ACTIONS) f32."""
    assert block_b >= 128
    w1, b1, w2, b2, w3, b3 = params
    B = x.shape[0]

    num_tiles, tb, B_pad = _choose_tiles(B, block_b)
    grid = (num_tiles,)

    const = lambda i: (0, 0)   # weights/biases: resident across all batch tiles
    out = pl.pallas_call(
        dqn_kernel,
        out_shape=jax.ShapeDtypeStruct((N_ACTIONS, B_pad), jnp.float32),
        grid=grid,
        in_specs=[
            pl.BlockSpec((tb, N_OBSERVATIONS), lambda i: (i, 0)),      # x (partial
            pl.BlockSpec((HIDDEN, N_OBSERVATIONS), const),             #   tail ok)
            pl.BlockSpec((HIDDEN, 1), const),                          # b1
            pl.BlockSpec((HIDDEN, HIDDEN), const),                     # w2 (bf16)
            pl.BlockSpec((HIDDEN, 1), const),                          # b2
            pl.BlockSpec((HIDDEN, N_ACTIONS), const),                  # w3
            pl.BlockSpec((1, 1), const),                               # b3
        ],
        out_specs=pl.BlockSpec((N_ACTIONS, tb), lambda i: (0, i)),
        compiler_params=pltpu.CompilerParams(
            dimension_semantics=("parallel",)),
    )(x.astype(jnp.float32), w1, b1, w2, b2, w3, b3)

    # (1, B_pad) -> (B, 1): padded tail columns (garbage rows beyond B) are dropped.
    return out[0, :B].reshape(B, N_ACTIONS)


def init_params(key):
    # Deterministic init mimicking torch.nn.Linear defaults:
    # U(-1/sqrt(fan_in), 1/sqrt(fan_in)) for weights and biases.
    # Weights stored (out_dim, in_dim) except w3 stored (in_dim, 1) for the
    # reduce-based final layer; biases stored as columns (out_dim, 1).
    # w2 is stored in bf16 once here (no per-call cast).
    ks = jax.random.split(key, 6)

    def u(k, shape, fan_in):
        bound = 1.0 / jnp.sqrt(jnp.float32(fan_in))
        return jax.random.uniform(k, shape, jnp.float32, -bound, bound)

    w1 = u(ks[0], (HIDDEN, N_OBSERVATIONS), N_OBSERVATIONS)
    b1 = u(ks[1], (HIDDEN, 1), N_OBSERVATIONS)
    w2 = u(ks[2], (HIDDEN, HIDDEN), HIDDEN).astype(jnp.bfloat16)
    b2 = u(ks[3], (HIDDEN, 1), HIDDEN)
    w3 = u(ks[4], (HIDDEN, N_ACTIONS), HIDDEN)
    b3 = u(ks[5], (1, 1), HIDDEN)
    return (w1, b1, w2, b2, w3, b3)


def dqn_reference(x, params):
    # Pure-f32 reference with the original module's semantics (bf16-stored w2 is
    # promoted back to f32, so the only deviation is in-kernel bf16 rounding of h1).
    w1, b1, w2, b2, w3, b3 = params
    w2f = w2.astype(jnp.float32)
    h1 = jnp.maximum(x @ w1.T + b1.T, 0.0)
    h2 = jnp.maximum(h1 @ w2f.T + b2.T, 0.0)
    return h2 @ w3 + b3


if __name__ == "__main__":
    key = jax.random.PRNGKey(0)
    k_x, k_p = jax.random.split(key)

    # B not a multiple of 128 to exercise the in-kernel partial-tile tail; with the
    # default block_b the >=2-tile rule gives grid=(2,) tiles of 256, so the batch
    # pipeline and megacore split are exercised even at small scale.
    B = 300
    x = jax.random.normal(k_x, (B, N_OBSERVATIONS), dtype=jnp.float32)
    params = init_params(k_p)

    out = dqn_forward(x, params)
    out = jax.block_until_ready(out)

    ref = dqn_reference(x, params)
    assert out.shape == (B, N_ACTIONS)
    # Layer-2 matmul uses bf16 operands (f32 accumulate) -> relaxed tolerance.
    assert jnp.allclose(out, ref, atol=2e-2, rtol=2e-2)

    print("KERNEL_OK")
</pallas_src>

<mosaic_0001>
module attributes {stable_mosaic.version = 11 : i64} {
  func.func @dqn_kernel(%arg0: i32, %arg1: memref<256x6xf32, #tpu.memory_space<vmem>>, %arg2: memref<128x6xf32, #tpu.memory_space<vmem>>, %arg3: memref<128x1xf32, #tpu.memory_space<vmem>>, %arg4: memref<128x128xbf16, #tpu.memory_space<vmem>>, %arg5: memref<128x1xf32, #tpu.memory_space<vmem>>, %arg6: memref<128x1xf32, #tpu.memory_space<vmem>>, %arg7: memref<1x1xf32, #tpu.memory_space<vmem>>, %arg8: memref<1x256xf32, #tpu.memory_space<vmem>>) attributes {dimension_semantics = [#tpu.dimension_semantics<parallel>], iteration_bounds = array<i64: 2>, scalar_prefetch = 0 : i64, scratch_operands = 0 : i64, tpu.core_type = #tpu.core_type<tc>, window_params = [{transform_indices = @transform_0, window_bounds = array<i64: 256, 6>}, {pipeline_mode = #tpu.pipeline_mode<synchronous>, transform_indices = @transform_1, window_bounds = array<i64: 128, 6>}, {pipeline_mode = #tpu.pipeline_mode<synchronous>, transform_indices = @transform_2, window_bounds = array<i64: 128, 1>}, {pipeline_mode = #tpu.pipeline_mode<synchronous>, transform_indices = @transform_3, window_bounds = array<i64: 128, 128>}, {pipeline_mode = #tpu.pipeline_mode<synchronous>, transform_indices = @transform_4, window_bounds = array<i64: 128, 1>}, {pipeline_mode = #tpu.pipeline_mode<synchronous>, transform_indices = @transform_5, window_bounds = array<i64: 128, 1>}, {pipeline_mode = #tpu.pipeline_mode<synchronous>, transform_indices = @transform_6, window_bounds = array<i64: 1, 1>}, {transform_indices = @transform_7, window_bounds = array<i64: 1, 256>}]} {
    %c0 = arith.constant 0 : index
    %c0_0 = arith.constant 0 : index
    %0 = vector.load %arg1[%c0, %c0_0] : memref<256x6xf32, #tpu.memory_space<vmem>>, vector<256x6xf32>
    %c0_1 = arith.constant 0 : index
    %c0_2 = arith.constant 0 : index
    %1 = vector.load %arg2[%c0_1, %c0_2] : memref<128x6xf32, #tpu.memory_space<vmem>>, vector<128x6xf32>
    %cst = arith.constant dense<0.000000e+00> : vector<128x256xf32>
    %2 = tpu.matmul %1, %0, %cst {dimension_numbers = #tpu.dot_dimension_numbers<[1], [1], [0], [0], [0, 0, 1, 0], [], []>} : vector<128x6xf32>, vector<256x6xf32>, vector<128x256xf32> -> vector<128x256xf32>
    %c0_3 = arith.constant 0 : index
    %c0_4 = arith.constant 0 : index
    %3 = vector.load %arg3[%c0_3, %c0_4] : memref<128x1xf32, #tpu.memory_space<vmem>>, vector<128x1xf32>
    %4 = vector.broadcast %3 : vector<128x1xf32> to vector<128x256xf32>
    %5 = arith.addf %2, %4 : vector<128x256xf32>
    %cst_5 = arith.constant 0.000000e+00 : f32
    %6 = vector.broadcast %cst_5 : f32 to vector<128x256xf32>
    %7 = arith.maximumf %5, %6 : vector<128x256xf32>
    %c0_6 = arith.constant 0 : index
    %c0_7 = arith.constant 0 : index
    %8 = vector.load %arg4[%c0_6, %c0_7] : memref<128x128xbf16, #tpu.memory_space<vmem>>, vector<128x128xbf16>
    %9 = arith.truncf %7 : vector<128x256xf32> to vector<128x256xbf16>
    %cst_8 = arith.constant dense<0.000000e+00> : vector<128x256xf32>
    %10 = tpu.matmul %8, %9, %cst_8 {dimension_numbers = #tpu.dot_dimension_numbers<[1], [0], [0], [1], [0, 0, 1, 1], [], []>} : vector<128x128xbf16>, vector<128x256xbf16>, vector<128x256xf32> -> vector<128x256xf32>
    %c0_9 = arith.constant 0 : index
    %c0_10 = arith.constant 0 : index
    %11 = vector.load %arg5[%c0_9, %c0_10] : memref<128x1xf32, #tpu.memory_space<vmem>>, vector<128x1xf32>
    %12 = vector.broadcast %11 : vector<128x1xf32> to vector<128x256xf32>
    %13 = arith.addf %10, %12 : vector<128x256xf32>
    %cst_11 = arith.constant 0.000000e+00 : f32
    %14 = vector.broadcast %cst_11 : f32 to vector<128x256xf32>
    %15 = arith.maximumf %13, %14 : vector<128x256xf32>
    %c0_12 = arith.constant 0 : index
    %c0_13 = arith.constant 0 : index
    %16 = vector.load %arg6[%c0_12, %c0_13] : memref<128x1xf32, #tpu.memory_space<vmem>>, vector<128x1xf32>
    %17 = vector.broadcast %16 : vector<128x1xf32> to vector<128x256xf32>
    %18 = arith.mulf %17, %15 : vector<128x256xf32>
    %cst_14 = arith.constant dense<0.000000e+00> : vector<256xf32>
    %19 = vector.multi_reduction <add>, %18, %cst_14 [0] : vector<128x256xf32> to vector<256xf32>
    %20 = vector.shape_cast %19 : vector<256xf32> to vector<1x256xf32>
    %c0_15 = arith.constant 0 : index
    %c0_16 = arith.constant 0 : index
    %21 = vector.load %arg7[%c0_15, %c0_16] : memref<1x1xf32, #tpu.memory_space<vmem>>, vector<1x1xf32>
    %22 = vector.broadcast %21 : vector<1x1xf32> to vector<1x256xf32>
    %23 = arith.addf %20, %22 : vector<1x256xf32>
    %c0_17 = arith.constant 0 : index
    %c0_18 = arith.constant 0 : index
    %24 = vector.load %arg8[%c0_17, %c0_18] : memref<1x256xf32, #tpu.memory_space<vmem>>, vector<1x256xf32>
    tpu.vector_store %arg8[%c0_17, %c0_18], %23 {strides = array<i32>} : memref<1x256xf32, #tpu.memory_space<vmem>>, vector<1x256xf32>,
    return
  }
  func.func @transform_0(%arg0: i32) -> (i32, i32) {
    %c0_i32 = arith.constant 0 : i32
    %c0_i32_0 = arith.constant 0 : i32
    return %arg0, %c0_i32 : i32, i32
  }
  func.func @transform_1(%arg0: i32) -> (i32, i32) {
    %c0_i32 = arith.constant 0 : i32
    %c0_i32_0 = arith.constant 0 : i32
    %c0_i32_1 = arith.constant 0 : i32
    return %c0_i32, %c0_i32_0 : i32, i32
  }
  func.func @transform_2(%arg0: i32) -> (i32, i32) {
    %c0_i32 = arith.constant 0 : i32
    %c0_i32_0 = arith.constant 0 : i32
    %c0_i32_1 = arith.constant 0 : i32
    return %c0_i32, %c0_i32_0 : i32, i32
  }
  func.func @transform_3(%arg0: i32) -> (i32, i32) {
    %c0_i32 = arith.constant 0 : i32
    %c0_i32_0 = arith.constant 0 : i32
    %c0_i32_1 = arith.constant 0 : i32
    return %c0_i32, %c0_i32_0 : i32, i32
  }
  func.func @transform_4(%arg0: i32) -> (i32, i32) {
    %c0_i32 = arith.constant 0 : i32
    %c0_i32_0 = arith.constant 0 : i32
    %c0_i32_1 = arith.constant 0 : i32
    return %c0_i32, %c0_i32_0 : i32, i32
  }
  func.func @transform_5(%arg0: i32) -> (i32, i32) {
    %c0_i32 = arith.constant 0 : i32
    %c0_i32_0 = arith.constant 0 : i32
    %c0_i32_1 = arith.constant 0 : i32
    return %c0_i32, %c0_i32_0 : i32, i32
  }
  func.func @transform_6(%arg0: i32) -> (i32, i32) {
    %c0_i32 = arith.constant 0 : i32
    %c0_i32_0 = arith.constant 0 : i32
    %c0_i32_1 = arith.constant 0 : i32
    return %c0_i32, %c0_i32_0 : i32, i32
  }
  func.func @transform_7(%arg0: i32) -> (i32, i32) {
    %c0_i32 = arith.constant 0 : i32
    %c0_i32_0 = arith.constant 0 : i32
    return %c0_i32, %arg0 : i32, i32
  }
}

</mosaic_0001>

<bundles_post_ra>
// kernel: tpu_custom_call.1
= control target key start
LH: loop header
LB: loop body
LE: loop exit
PB: predicated region body
PF: predicated region fallthrough
CT: control target
= control target key end

     0   :  { %s2096_s0 = inlined_call_operand.vmem [shape: f32[300,6], index: 0, kind: input, shape index: {}]   ;;  %s2097_s1 = inlined_call_operand.vmem [shape: f32[128,6], index: 1, kind: input, shape index: {}]   ;;  %s2098_s2 = inlined_call_operand.vmem [shape: f32[128,1], index: 2, kind: input, shape index: {}]   ;;  %s2099_s3 = inlined_call_operand.vmem [shape: bf16[128,128], index: 3, kind: input, shape index: {}]   ;;  %s2100_s4 = inlined_call_operand.vmem [shape: f32[128,1], index: 4, kind: input, shape index: {}]   ;;  %s2101_s5 = inlined_call_operand.vmem [shape: f32[128,1], index: 5, kind: input, shape index: {}]   ;;  %s2102_s6 = inlined_call_operand.<no memory space> [shape: f32[1,1], index: 6, kind: input, shape index: {}]   ;;  %s2103_s7 = inlined_call_operand.hbm [shape: f32[1,512], index: 7, kind: output, shape index: {}]  }
   0x1   :  { %v12_v0 = vstv %s2102_s6 }
   0x2   :  { %13 = vst [vmem:[#allocation2] sm:$0x1] %v12_v0 }
   0x3   :  { %14 = vsyncpa [#allocation4], 0 }
   0x4   :  { %16 = vsyncpa [#allocation4 + $0x1], 0  ;;  %s1590_s26 = smov 0   ;;  %s1592_s27 = smov 0  }
   0x5   :  { %s1594_s28 = smov 0   ;;  %s1596_s29 = smov 0  }
   0x6 LB: > { %s1611_s6 = sadd.s32 4294967295, %s1544_s29   ;;  %s1324_s30 = sadd.s32 4294967294, %s1544_s29   ;;  %s1544_s29 = sphi %s1596_s29, %s2109_s29   ;;  %s1540_s28 = sphi %s1594_s28, %s2108_s28   ;;  %s1536_s27 = sphi %s1592_s27, %s2107_s27   ;;  %s1532_s26 = sphi %s1590_s26, %s2106_s26  }
   0x7   : > { %s1615_s8 = sadd.s32 1, %s1544_s29   ;;  %s181_s9 = sadd.s32 1, %s1540_s28 }
   0x8   : > { %s178_s10 = ssub.s32 %s1544_s29, %s1615_s8  ;;  %p191_p0 = scmp.ne.s32.totalorder %s1540_s28, %s1536_s27 }
   0x9   : > { %p179_p1 = scmp.eq.s32.totalorder %s178_s10, 0  ;;  %p192_p2 = scmp.eq.s32.totalorder %s1611_s6, 1 }
   0xa   : > { %p197_p3 = scmp.ne.s32.totalorder %s1536_s27, %s1532_s26  ;;  %p198_p4 = scmp.eq.s32.totalorder %s1324_s30, 1 }
   0xb   : > { %s1626_s11 = scalar_select %p179_p1, %s1540_s28, %s181_s9  }
   0xc   : > { %p1628_p5 = por %p192_p2, %p191_p0  ;;  %p1632_p6 = por %p198_p4, %p197_p3 }
   0xd   : > { %p1327_p7 = scmp.ge.s32.totalorder %s1544_s29, 1  ;;  %p251_p8 = scmp.lt.s32.totalorder %s1544_s29, 3 }
   0xf   : > { %p252_p9 = pnand %p1327_p7, %p251_p8 }
  0x10   : > { %s1329_s14 = sshll.u32 (!%p252_p9), %s1611_s6, 5  ;;  %s1428_s16 = sshll.u32 (!%p252_p9), %s1611_s6, 1 }
  0x11   : > { %255 = sbr.rel (%p252_p9) target bundleno = 653 (0x28d), region = 48  ;;  %p292_p10 = scmp.lt.s32.totalorder (!%p252_p9), %s1329_s14, 37 }
  0x12   : > { %s1260_s20 = scalar_lea.hbm (!%p252_p9), %s2103_s7, %s1428_s16  ;;  %s1502_s9 = scalar_lea.hbm (!%p252_p9), %s2103_s7, 4 }
  0x13   : > { %s1264_s23 = sshll.u32 (!%p252_p9), %s1260_s20, 4  ;;  %s1265_s23 = int_to_ptr.hbm [resolvable:$true] %s1264_s23 }
  0x16   : > { %s2111_s14 = smov (!%p292_p10, %s1329_s14), 37  ;;  %vm446_vm0 = vcmask 48128   ;;  %v364_v7 = vld [vmem:[%s2098_s2 + $0x70] sm:$0xff]  ;;  %v1546_v10 = vmov 0   ;;  %v365_v13 = vld [vmem:[%s2098_s2 + $0x78] sm:$0xff]  ;;  %v358_v18 = vld [vmem:[%s2098_s2 + $0x40] sm:$0xff] }
  0x17   : > { %s1330_s15 = sshll.u32 %s2111_s14, 3  ;;  %1479 = vset.pattern.permute.xlu0 %v1546_v10  ;;  %1481 = vset.pattern.permute.xlu2 %v1546_v10  ;;  %v362_v23 = vld [vmem:[%s2098_s2 + $0x60] sm:$0xff]  ;;  %v360_v24 = vld [vmem:[%s2098_s2 + $0x50] sm:$0xff]  ;;  %v357_v25 = vld [vmem:[%s2098_s2 + $0x38] sm:$0xff]  ;;  %s284_s14 = sand.u32 1, %s1536_s27   ;;  %vm1241_vm1 = vcmask 1040384  }
  0x18   : > { %s1642_s18 = scalar_lea.vmem %s2096_s0, %s1330_s15  ;;  %438 = vperm.xlu0 %1479, %v364_v7   ;;  %1480 = vset.pattern.permute.xlu1 %v1546_v10  ;;  %v363_v30 = vld [vmem:[%s2098_s2 + $0x68] sm:$0xff]  ;;  %v361_v31 = vld [vmem:[%s2098_s2 + $0x58] sm:$0xff]  ;;  %v352_v32 = vld [vmem:[%s2098_s2 + $0x10] sm:$0xff]  ;;  %s1328_s15 = sshll.u32 %s284_s14, 1 }
  0x19   : > { %v317_v1 = vld [vmem:[%s1642_s18 + $0x78] sm:$0xff]  ;;  %v316_v3 = vld [vmem:[%s1642_s18 + $0x70] sm:$0xff]  ;;  %v315_v5 = vld [vmem:[%s1642_s18 + $0x68] sm:$0xff]  ;;  %428 = vperm.xlu1 %1480, %v362_v23   ;;  %418 = vperm.xlu2 %1481, %v360_v24   ;;  %s286_s21 = scalar_lea.vmem [#allocation3], %s1328_s15  ;;  %s1250_s6 = scalar_lea.sflag [#allocation4], %s284_s14 }
  0x1a   : > { %v333_v2 = vld [vmem:[%s1642_s18 + $0xf8] sm:$0xff]  ;;  %1331 = vmatpush.xpose.msk.msra.mxu0 %vm446_vm0, %v317_v1  ;;  %v332_v4 = vld [vmem:[%s1642_s18 + $0xf0] sm:$0xff]  ;;  %v331_v6 = vld [vmem:[%s1642_s18 + $0xe8] sm:$0xff]  ;;  %s1262_s22 = sshll.u32 %s286_s21, 4  ;;  %s1263_s22 = int_to_ptr.vmem [resolvable:$true] %s1262_s22 }
  0x1b   : > { %1363 = vmatpush.xpose.msk.msra.mxu1 %vm446_vm0, %v333_v2  ;;  %v314_v8 = vld [vmem:[%s1642_s18 + $0x60] sm:$0xff]  ;;  %v313_v11 = vld [vmem:[%s1642_s18 + $0x58] sm:$0xff]  ;;  %v312_v14 = vld [vmem:[%s1642_s18 + $0x50] sm:$0xff] }
  0x1c   : > { %v330_v9 = vld [vmem:[%s1642_s18 + $0xe0] sm:$0xff]  ;;  %v329_v12 = vld [vmem:[%s1642_s18 + $0xd8] sm:$0xff]  ;;  %v328_v15 = vld [vmem:[%s1642_s18 + $0xd0] sm:$0xff] }
  0x1d   : > { %v311_v16 = vld [vmem:[%s1642_s18 + $0x48] sm:$0xff]  ;;  %v310_v19 = vld [vmem:[%s1642_s18 + $0x40] sm:$0xff]  ;;  %v309_v21 = vld [vmem:[%s1642_s18 + $0x38] sm:$0xff] }
  0x1e   : > { %1332 = vmatpush.xpose.msk.msra.mxu0 %vm446_vm0, %v316_v3  ;;  %v327_v17 = vld [vmem:[%s1642_s18 + $0xc8] sm:$0xff]  ;;  %v326_v20 = vld [vmem:[%s1642_s18 + $0xc0] sm:$0xff]  ;;  %v325_v22 = vld [vmem:[%s1642_s18 + $0xb8] sm:$0xff] }
  0x1f   : > { %1364 = vmatpush.xpose.msk.msra.mxu1 %vm446_vm0, %v332_v4  ;;  %v308_v26 = vld [vmem:[%s1642_s18 + $0x30] sm:$0xff]  ;;  %v307_v28 = vld [vmem:[%s1642_s18 + $0x28] sm:$0xff]  ;;  %v306_v33 = vld [vmem:[%s1642_s18 + $0x20] sm:$0xff] }
  0x20   : > { %443 = vperm.xlu0 %1479, %v365_v13   ;;  %v324_v27 = vld [vmem:[%s1642_s18 + $0xb0] sm:$0xff]  ;;  %v323_v29 = vld [vmem:[%s1642_s18 + $0xa8] sm:$0xff]  ;;  %v322_v34 = vld [vmem:[%s1642_s18 + $0xa0] sm:$0xff] }
  0x21   : > { %433 = vperm.xlu1 %1480, %v363_v30   ;;  %423 = vperm.xlu2 %1481, %v361_v31   ;;  %v305_v35 = vld [vmem:[%s1642_s18 + $0x18] sm:$0xff]  ;;  %v359_v37 = vld [vmem:[%s2098_s2 + $0x48] sm:$0xff]  ;;  %v356_v38 = vld [vmem:[%s2098_s2 + $0x30] sm:$0xff] }
  0x22   : > { %1333 = vmatpush.xpose.msk.msra.mxu0 %vm446_vm0, %v315_v5  ;;  %v321_v36 = vld [vmem:[%s1642_s18 + $0x98] sm:$0xff]  ;;  %v351_v39 = vld [vmem:[%s2098_s2 + $0x8] sm:$0xff]  ;;  %v304_v40 = vld [vmem:[%s1642_s18 + $0x10] sm:$0xff] }
  0x23   : > { %1365 = vmatpush.xpose.msk.msra.mxu1 %vm446_vm0, %v331_v6  ;;  %v320_v41 = vld [vmem:[%s1642_s18 + $0x90] sm:$0xff]  ;;  %v303_v42 = vld [vmem:[%s1642_s18 + $0x8] sm:$0xff]  ;;  %v354_v45 = vld [vmem:[%s2098_s2 + $0x20] sm:$0xff] }
  0x24   : > { %v319_v43 = vld [vmem:[%s1642_s18 + $0x88] sm:$0xff]  ;;  %v302_v46 = vld [vmem:[%s1642_s18] sm:$0xff]  ;;  %v353_v49 = vld [vmem:[%s2098_s2 + $0x18] sm:$0xff] }
  0x25   : > { %v355_v44 = vld [vmem:[%s2098_s2 + $0x28] sm:$0xff]  ;;  %v318_v47 = vld [vmem:[%s1642_s18 + $0x80] sm:$0xff]  ;;  %v787_v51 = vld [vmem:[%s2100_s4 + $0x10] sm:$0xff]  ;;  %s1496_s18 = sshra.s32 %s1265_s23, 4  ;;  %s1497_s18 = int_to_ptr.hbm [resolvable:$true] %s1496_s18 }
  0x26   : > { %1334 = vmatpush.xpose.msk.msra.mxu0 %vm446_vm0, %v314_v8  ;;  %v334_v48 = vld [vmem:[%s2097_s1] sm:$0xff]  ;;  %v335_v52 = vld [vmem:[%s2097_s1 + $0x8] sm:$0xff]  ;;  %v336_v55 = vld [vmem:[%s2097_s1 + $0x10] sm:$0xff]  ;;  %s1498_s24 = scalar_lea.hbm %s1497_s18, 2  ;;  %p1503_p0 = scmp.lt.s32.totalorder %s1497_s18, %s2103_s7 }
  0x27   : > { %1366 = vmatpush.xpose.msk.msra.mxu1 %vm446_vm0, %v330_v9  ;;  %v350_v50 = vld [vmem:[%s2098_s2] sm:$0xff]  ;;  %v790_v54 = vld [vmem:[%s2100_s4 + $0x28] sm:$0xff]  ;;  %v788_v56 = vld [vmem:[%s2100_s4 + $0x18] sm:$0xff]  ;;  %p1499_p11 = scmp.ne.s32.totalorder %s1497_s18, %s1498_s24  ;;  %p1504_p1 = scmp.lt.s32.totalorder %s1502_s9, %s1498_s24 }
  0x28   : > { %408 = vperm.xlu0 %1479, %v358_v18   ;;  %v785_v53 = vld [vmem:[%s2100_s4] sm:$0xff]  ;;  %v337_v58 = vld [vmem:[%s2097_s1 + $0x18] sm:$0xff]  ;;  %v791_v59 = vld [vmem:[%s2100_s4 + $0x30] sm:$0xff] }
  0x29   : > { %413 = vperm.xlu1 %1480, %v359_v37   ;;  %398 = vperm.xlu2 %1481, %v356_v38   ;;  %v793_v57 = vld [vmem:[%s2100_s4 + $0x40] sm:$0xff]  ;;  %v796_v60 = vld [vmem:[%s2100_s4 + $0x58] sm:$0xff]  ;;  %v794_v62 = vld [vmem:[%s2100_s4 + $0x48] sm:$0xff]  ;;  %p1500_p12 = pnand %p1499_p11, %p1628_p5  ;;  %p1505_p2 = por %p1504_p1, %p1503_p0 }
  0x2a   : > { %1335 = vmatpush.xpose.msk.msra.mxu0 %vm446_vm0, %v313_v11  ;;  %v338_v61 = vld [vmem:[%s2097_s1 + $0x20] sm:$0xff]  ;;  %v799_v63 = vld [vmem:[%s2100_s4 + $0x70] sm:$0xff]  ;;  %v786_v0 = vld [vmem:[%s2100_s4 + $0x8] sm:$0xff] }
  0x2b   : > { %1367 = vmatpush.xpose.msk.msra.mxu1 %vm446_vm0, %v329_v12  ;;  %v339_v1 = vld [vmem:[%s2097_s1 + $0x28] sm:$0xff]  ;;  %v797_v2 = vld [vmem:[%s2100_s4 + $0x60] sm:$0xff]  ;;  %v340_v5 = vld [vmem:[%s2097_s1 + $0x30] sm:$0xff]  ;;  %p1501_p13 = pneg %p1500_p12 }
  0x2c   : > { %v1060_v3 = vld [vmem:[%s2101_s5 + $0x8] sm:$0xff]  ;;  %v789_v4 = vld [vmem:[%s2100_s4 + $0x20] sm:$0xff]  ;;  %v800_v6 = vld [vmem:[%s2100_s4 + $0x78] sm:$0xff] }
  0x2d   : > { %v1063_v7 = vld [vmem:[%s2101_s5 + $0x20] sm:$0xff]  ;;  %v792_v8 = vld [vmem:[%s2100_s4 + $0x38] sm:$0xff]  ;;  %v1061_v10 = vld [vmem:[%s2101_s5 + $0x10] sm:$0xff]  ;;  %p1506_p3 = pnand %p1505_p2, %p1501_p13 }
  0x2e   : > { %1336 = vmatpush.xpose.msk.msra.mxu0 %vm446_vm0, %v312_v14  ;;  %v341_v9 = vld [vmem:[%s2097_s1 + $0x38] sm:$0xff]  ;;  %v795_v12 = vld [vmem:[%s2100_s4 + $0x50] sm:$0xff]  ;;  %v342_v13 = vld [vmem:[%s2097_s1 + $0x40] sm:$0xff] }
  0x2f   : > { %1368 = vmatpush.xpose.msk.msra.mxu1 %vm446_vm0, %v328_v15  ;;  %v1066_v11 = vld [vmem:[%s2101_s5 + $0x38] sm:$0xff]  ;;  %v1064_v14 = vld [vmem:[%s2101_s5 + $0x28] sm:$0xff]  ;;  %v1069_v15 = vld [vmem:[%s2101_s5 + $0x50] sm:$0xff] }
  0x30   : > { %403 = vperm.xlu0 %1479, %v357_v25   ;;  %v1067_v18 = vld [vmem:[%s2101_s5 + $0x40] sm:$0xff]  ;;  %v1062_v24 = vld [vmem:[%s2101_s5 + $0x18] sm:$0xff]  ;;  %v1065_v31 = vld [vmem:[%s2101_s5 + $0x30] sm:$0xff] }
  0x31   : > { %393 = vperm.xlu2 %1481, %v355_v44   ;;  %388 = vperm.xlu1 %1480, %v354_v45   ;;  %v1229_v23 = vld [vmem:[#allocation2] sm:$0x1]  ;;  %v348_v38 = vld [vmem:[%s2097_s1 + $0x70] sm:$0xff] }
  0x32   : > { %1337 = vmatpush.xpose.msk.msra.mxu0 %vm446_vm0, %v311_v16  ;;  %v798_v16 = vld [vmem:[%s2100_s4 + $0x68] sm:$0xff]  ;;  %v346_v30 = vld [vmem:[%s2097_s1 + $0x60] sm:$0xff] }
  0x33   : > { %1369 = vmatpush.xpose.msk.msra.mxu1 %vm446_vm0, %v327_v17  ;;  %v343_v17 = vld [vmem:[%s2097_s1 + $0x48] sm:$0xff] }
  0x36   : > { %1338 = vmatpush.xpose.msk.msra.mxu0 %vm446_vm0, %v310_v19  ;;  %v1072_v19 = vld [vmem:[%s2101_s5 + $0x68] sm:$0xff] }
  0x37   : > { %1370 = vmatpush.xpose.msk.msra.mxu1 %vm446_vm0, %v326_v20  ;;  %v1059_v20 = vld [vmem:[%s2101_s5] sm:$0xff] }
  0x38   : > { %378 = vperm.xlu0 %1479, %v352_v32  }
  0x39   : > { %383 = vperm.xlu1 %1480, %v353_v49   ;;  %368 = vperm.xlu2 %1481, %v350_v50  }
  0x3a   : > { %1339 = vmatpush.xpose.msk.msra.mxu0 %vm446_vm0, %v309_v21  ;;  %v344_v21 = vld [vmem:[%s2097_s1 + $0x50] sm:$0xff] }
  0x3b   : > { %1371 = vmatpush.xpose.msk.msra.mxu1 %vm446_vm0, %v325_v22  ;;  %v1070_v22 = vld [vmem:[%s2101_s5 + $0x58] sm:$0xff] }
  0x3e   : > { %1340 = vmatpush.xpose.msk.msra.mxu0 %vm446_vm0, %v308_v26  ;;  %v345_v26 = vld [vmem:[%s2097_s1 + $0x58] sm:$0xff] }
  0x3f   : > { %1372 = vmatpush.xpose.msk.msra.mxu1 %vm446_vm0, %v324_v27  ;;  %v1073_v27 = vld [vmem:[%s2101_s5 + $0x70] sm:$0xff] }
  0x40   : > { %373 = vperm.xlu0 %1479, %v351_v39   ;;  %v1071_v39 = vld [vmem:[%s2101_s5 + $0x60] sm:$0xff] }
  0x41   : > { %803 = vperm.xlu1 %1480, %v785_v53   ;;  %808 = vperm.xlu2 %1481, %v786_v0  }
  0x42   : > { %1341 = vmatpush.xpose.msk.msra.mxu0 %vm446_vm0, %v307_v28 }
  0x43   : > { %1373 = vmatpush.xpose.msk.msra.mxu1 %vm446_vm0, %v323_v29 }
  0x46   : > { %1342 = vmatpush.xpose.msk.msra.mxu0 %vm446_vm0, %v306_v33  ;;  %v347_v33 = vld [vmem:[%s2097_s1 + $0x68] sm:$0xff] }
  0x47   : > { %1374 = vmatpush.xpose.msk.msra.mxu1 %vm446_vm0, %v322_v34 }
  0x48   : > { %813 = vperm.xlu0 %1479, %v787_v51  }
  0x49   : > { %818 = vperm.xlu1 %1480, %v788_v56   ;;  %823 = vperm.xlu2 %1481, %v789_v4  }
  0x4a   : > { %1343 = vmatpush.xpose.msk.msra.mxu0 %vm446_vm0, %v305_v35  ;;  %v1068_v35 = vld [vmem:[%s2101_s5 + $0x48] sm:$0xff] }
  0x4b   : > { %1375 = vmatpush.xpose.msk.msra.mxu1 %vm446_vm0, %v321_v36 }
  0x4e   : > { %1344 = vmatpush.xpose.msk.msra.mxu0 %vm446_vm0, %v304_v40 }
  0x4f   : > { %1376 = vmatpush.xpose.msk.msra.mxu1 %vm446_vm0, %v320_v41  ;;  %v349_v41 = vld [vmem:[%s2097_s1 + $0x78] sm:$0xff] }
  0x50   : > { %828 = vperm.xlu0 %1479, %v790_v54  }
  0x51   : > { %833 = vperm.xlu1 %1480, %v791_v59   ;;  %838 = vperm.xlu2 %1481, %v792_v8  }
  0x52   : > { %1345 = vmatpush.xpose.msk.msra.mxu0 %vm446_vm0, %v303_v42 }
  0x53   : > { %1377 = vmatpush.xpose.msk.msra.mxu1 %vm446_vm0, %v319_v43  ;;  %v1074_v43 = vld [vmem:[%s2101_s5 + $0x78] sm:$0xff] }
  0x56   : > { %1346 = vmatpush.xpose.msk.msra.mxu0 %vm446_vm0, %v302_v46 }
  0x57   : > { %1378 = vmatpush.xpose.msk.msra.mxu1 %vm446_vm0, %v318_v47 }
  0x58   : > { %843 = vperm.xlu0 %1479, %v793_v57  }
  0x59   : > { %1347 = vmatmul.msk.f32.vlgmr.msra.gmra.mxu0 %vm446_vm0, %v334_v48  ;;  %848 = vperm.xlu1 %1480, %v794_v62  }
  0x5a   : > { %1379 = vmatmul.msk.f32.vlgmr.msra.gmra.mxu1 %vm446_vm0, %v334_v48  ;;  %853 = vperm.xlu2 %1481, %v795_v12  }
  0x60   : > { %858 = vperm.xlu0 %1479, %v796_v60  }
  0x61   : > { %1348 = vmatmul.msk.f32.gmra.mxu0 %vm446_vm0, %v335_v52  ;;  %863 = vperm.xlu1 %1480, %v797_v2  }
  0x62   : > { %1380 = vmatmul.msk.f32.gmra.mxu1 %vm446_vm0, %v335_v52  ;;  %868 = vperm.xlu2 %1481, %v798_v16  }
  0x68   : > { %873 = vperm.xlu0 %1479, %v799_v63  }
  0x69   : > { %1349 = vmatmul.msk.f32.gmra.mxu0 %vm446_vm0, %v336_v55  ;;  %878 = vperm.xlu1 %1480, %v800_v6  }
  0x6a   : > { %1381 = vmatmul.msk.f32.gmra.mxu1 %vm446_vm0, %v336_v55  ;;  %1077 = vperm.xlu2 %1481, %v1059_v20  }
  0x70   : > { %1082 = vperm.xlu0 %1479, %v1060_v3  }
  0x71   : > { %1350 = vmatmul.msk.f32.gmra.mxu0 %vm446_vm0, %v337_v58  ;;  %1087 = vperm.xlu1 %1480, %v1061_v10  }
  0x72   : > { %1382 = vmatmul.msk.f32.gmra.mxu1 %vm446_vm0, %v337_v58  ;;  %1092 = vperm.xlu2 %1481, %v1062_v24  }
  0x73   : > { %v1902_v28 = vpop.permute.xlu2 %418 }
  0x78   : > { %1097 = vperm.xlu0 %1479, %v1063_v7  }
  0x79   : > { %1351 = vmatmul.msk.f32.gmra.mxu0 %vm446_vm0, %v338_v61  ;;  %1102 = vperm.xlu1 %1480, %v1064_v14  }
  0x7a   : > { %1383 = vmatmul.msk.f32.gmra.mxu1 %vm446_vm0, %v338_v61  ;;  %1107 = vperm.xlu2 %1481, %v1065_v31  }
  0x7b   : > { %v1914_v32 = vpop.permute.xlu2 %423 }
  0x80   : > { %1112 = vperm.xlu0 %1479, %v1066_v11  }
  0x81   : > { %1352 = vmatmul.msk.f32.gmra.mxu0 %vm446_vm0, %v339_v1  ;;  %1117 = vperm.xlu1 %1480, %v1067_v18  }
  0x82   : > { %1384 = vmatmul.msk.f32.gmra.mxu1 %vm446_vm0, %v339_v1  ;;  %1122 = vperm.xlu2 %1481, %v1068_v35  }
  0x83   : > { %v1928_v37 = vpop.permute.xlu2 %398 }
  0x88   : > { %1127 = vperm.xlu0 %1479, %v1069_v15  }
  0x89   : > { %1353 = vmatmul.msk.f32.gmra.mxu0 %vm446_vm0, %v340_v5  ;;  %1132 = vperm.xlu1 %1480, %v1070_v22  }
  0x8a   : > { %1385 = vmatmul.msk.f32.gmra.mxu1 %vm446_vm0, %v340_v5  ;;  %v1892_v25 = vpop.permute.xlu0 %438  ;;  %1137 = vperm.xlu2 %1481, %v1071_v39  }
  0x8b   : > { %v1926_v36 = vpop.permute.xlu1 %428  ;;  %v394_v44 = vpop.permute.xlu2 %393 }
  0x90   : > { %1142 = vperm.xlu0 %1479, %v1072_v19  }
  0x91   : > { %1354 = vmatmul.msk.f32.gmra.mxu0 %vm446_vm0, %v341_v9  ;;  %1147 = vperm.xlu1 %1480, %v1073_v27  }
  0x92   : > { %1386 = vmatmul.msk.f32.gmra.mxu1 %vm446_vm0, %v341_v9  ;;  %v1904_v29 = vpop.permute.xlu0 %443  ;;  %1152 = vperm.xlu2 %1481, %v1074_v43  }
  0x93   : > { %v1943_v42 = vpop.permute.xlu1 %433  ;;  %v369_v49 = vpop.permute.xlu2 %368 }
  0x98   : > { %1232 = vperm.xlu0 %1479, %v1229_v23  }
  0x99   : > { %1355 = vmatmul.msk.f32.gmra.mxu0 %vm446_vm0, %v342_v13 }
  0x9a   : > { %1387 = vmatmul.msk.f32.gmra.mxu1 %vm446_vm0, %v342_v13  ;;  %v1919_v34 = vpop.permute.xlu0 %408 }
  0x9b   : > { %v1950_v48 = vpop.permute.xlu1 %413 }
  0xa1   : > { %1356 = vmatmul.msk.f32.gmra.mxu0 %vm446_vm0, %v343_v17 }
  0xa2   : > { %1388 = vmatmul.msk.f32.gmra.mxu1 %vm446_vm0, %v343_v17  ;;  %v1936_v40 = vpop.permute.xlu0 %403 }
  0xa3   : > { %v389_v61 = vpop.permute.xlu1 %388 }
  0xa9   : > { %1357 = vmatmul.msk.f32.gmra.mxu0 %vm446_vm0, %v344_v21 }
  0xaa   : > { %1389 = vmatmul.msk.f32.gmra.mxu1 %vm446_vm0, %v344_v21  ;;  %v379_v45 = vpop.permute.xlu0 %378 }
  0xab   : > { %v384_v2 = vpop.permute.xlu1 %383 }
  0xb1   : > { %1358 = vmatmul.msk.f32.gmra.mxu0 %vm446_vm0, %v345_v26 }
  0xb2   : > { %1390 = vmatmul.msk.f32.gmra.mxu1 %vm446_vm0, %v345_v26  ;;  %v374_v50 = vpop.permute.xlu0 %373 }
  0xb9   : > { %1359 = vmatmul.msk.f32.gmra.mxu0 %vm446_vm0, %v346_v30 }
  0xba   : > { %1391 = vmatmul.msk.f32.gmra.mxu1 %vm446_vm0, %v346_v30 }
  0xc1   : > { %1360 = vmatmul.msk.f32.gmra.mxu0 %vm446_vm0, %v347_v33 }
  0xc2   : > { %1392 = vmatmul.msk.f32.gmra.mxu1 %vm446_vm0, %v347_v33 }
  0xc9   : > { %1361 = vmatmul.msk.f32.gmra.mxu0 %vm446_vm0, %v348_v38 }
  0xca   : > { %1393 = vmatmul.msk.f32.gmra.mxu1 %vm446_vm0, %v348_v38 }
  0xd1   : > { %1362 = vmatmul.msk.f32.gmra.mxu0 %vm446_vm0, %v349_v41 }
  0xd2   : > { %1394 = vmatmul.msk.f32.gmra.mxu1 %vm446_vm0, %v349_v41 }
  0xd6   : > { %v608_v46 = vpop.f32.mrf.mxu0 }
  0xd7   : > { %v673_v47 = vpop.f32.mrf.mxu1  ;;  %v609_v51 = vadd.f32 %v608_v46, %v369_v49 }
  0xd8   : > { %v674_v52 = vadd.f32 %v673_v47, %v369_v49 }
  0xd9   : > { %v721_v57 = vmax.f32 %v609_v51, 0.0 }
  0xda   : > { %v722_v58 = vmax.f32 %v674_v52, 0.0 }
  0xde   : > { %v611_v53 = vpop.f32.mrf.mxu0 }
  0xdf   : > { %v676_v54 = vpop.f32.mrf.mxu1  ;;  %v612_v55 = vadd.f32 %v611_v53, %v374_v50 }
  0xe0   : > { %v677_v56 = vadd.f32 %v676_v54, %v374_v50 }
  0xe1   : > { %v723_v59 = vmax.f32 %v612_v55, 0.0 }
  0xe2   : > { %v724_v60 = vmax.f32 %v677_v56, 0.0 }
  0xe3   : > { %v1952_v62 = vpack.c.bf16 %v723_v59, %v721_v57 }
  0xe4   : > { %v1954_v63 = vpack.c.bf16 %v724_v60, %v722_v58 }
  0xe6   : > { %v614_v0 = vpop.f32.mrf.mxu0 }
  0xe7   : > { %v679_v1 = vpop.f32.mrf.mxu1  ;;  %v615_v3 = vadd.f32 %v614_v0, %v379_v45 }
  0xe8   : > { %v680_v4 = vadd.f32 %v679_v1, %v379_v45 }
  0xe9   : > { %v725_v9 = vmax.f32 %v615_v3, 0.0 }
  0xea   : > { %v726_v10 = vmax.f32 %v680_v4, 0.0 }
  0xee   : > { %v617_v5 = vpop.f32.mrf.mxu0 }
  0xef   : > { %v682_v6 = vpop.f32.mrf.mxu1  ;;  %v618_v7 = vadd.f32 %v617_v5, %v384_v2 }
  0xf0   : > { %v683_v8 = vadd.f32 %v682_v6, %v384_v2 }
  0xf1   : > { %v727_v11 = vmax.f32 %v618_v7, 0.0 }
  0xf2   : > { %v728_v12 = vmax.f32 %v683_v8, 0.0 }
  0xf3   : > { %v1956_v13 = vpack.c.bf16 %v727_v11, %v725_v9 }
  0xf4   : > { %v1958_v14 = vpack.c.bf16 %v728_v12, %v726_v10 }
  0xf6   : > { %v620_v15 = vpop.f32.mrf.mxu0 }
  0xf7   : > { %v685_v16 = vpop.f32.mrf.mxu1  ;;  %v621_v17 = vadd.f32 %v620_v15, %v389_v61 }
  0xf8   : > { %v686_v18 = vadd.f32 %v685_v16, %v389_v61 }
  0xf9   : > { %v729_v23 = vmax.f32 %v621_v17, 0.0 }
  0xfa   : > { %v730_v24 = vmax.f32 %v686_v18, 0.0 }
  0xfe   : > { %v623_v19 = vpop.f32.mrf.mxu0 }
  0xff   : > { %v688_v20 = vpop.f32.mrf.mxu1  ;;  %v624_v21 = vadd.f32 %v623_v19, %v394_v44 }
 0x100   : > { %v689_v22 = vadd.f32 %v688_v20, %v394_v44 }
 0x101   : > { %v731_v26 = vmax.f32 %v624_v21, 0.0 }
 0x102   : > { %v732_v27 = vmax.f32 %v689_v22, 0.0 }
 0x103   : > { %v1960_v30 = vpack.c.bf16 %v731_v26, %v729_v23 }
 0x104   : > { %v1962_v31 = vpack.c.bf16 %v732_v27, %v730_v24 }
 0x106   : > { %v626_v33 = vpop.f32.mrf.mxu0 }
 0x107   : > { %v691_v35 = vpop.f32.mrf.mxu1  ;;  %v627_v38 = vadd.f32 %v626_v33, %v1928_v37 }
 0x108   : > { %v692_v39 = vadd.f32 %v691_v35, %v1928_v37 }
 0x109   : > { %v733_v46 = vmax.f32 %v627_v38, 0.0 }
 0x10a   : > { %v734_v47 = vmax.f32 %v692_v39, 0.0 }
 0x10e   : > { %v629_v41 = vpop.f32.mrf.mxu0 }
 0x10f   : > { %v694_v43 = vpop.f32.mrf.mxu1  ;;  %v630_v45 = vadd.f32 %v629_v41, %v1936_v40 }
 0x110   : > { %v695_v44 = vadd.f32 %v694_v43, %v1936_v40 }
 0x111   : > { %v735_v49 = vmax.f32 %v630_v45, 0.0 }
 0x112   : > { %v736_v50 = vmax.f32 %v695_v44, 0.0 }
 0x113   : > { %v1968_v51 = vpack.c.bf16 %v735_v49, %v733_v46 }
 0x114   : > { %v1970_v52 = vpack.c.bf16 %v736_v50, %v734_v47 }
 0x116   : > { %v632_v53 = vpop.f32.mrf.mxu0 }
 0x117   : > { %v697_v54 = vpop.f32.mrf.mxu1  ;;  %v633_v39 = vadd.f32 %v632_v53, %v1919_v34  ;;  %v809_v53 = vpop.permute.xlu2 %808 }
 0x118   : > { %v698_v41 = vadd.f32 %v697_v54, %v1919_v34  ;;  %v1431_v34 = vld [vmem:[%s2099_s3] sm:$0xff] }
 0x119   : > { %v737_v49 = vmax.f32 %v633_v39, 0.0 }
 0x11a   : > { %v738_v50 = vmax.f32 %v698_v41, 0.0 }
 0x11e   : > { %v635_v55 = vpop.f32.mrf.mxu0 }
 0x11f   : > { %v700_v56 = vpop.f32.mrf.mxu1 }
 0x120   : > { %v701_v27 = vadd.f32 %v700_v56, %v1950_v48 }
 0x122   : > { %v740_v44 = vmax.f32 %v701_v27, 0.0 }
 0x126   : > { %v638_v57 = vpop.f32.mrf.mxu0 }
 0x127   : > { %v703_v37 = vpop.f32.mrf.mxu1  ;;  %v639_v23 = vadd.f32 %v638_v57, %v1902_v28  ;;  %v824_v57 = vpop.permute.xlu2 %823 }
 0x129   : > { %v741_v43 = vmax.f32 %v639_v23, 0.0 }
 0x12e   : > { %v641_v58 = vpop.f32.mrf.mxu0 }
 0x12f   : > { %v706_v59 = vpop.f32.mrf.mxu1 }
 0x130   : > { %v707_v19 = vadd.f32 %v706_v59, %v1914_v32 }
 0x132   : > { %v744_v35 = vmax.f32 %v707_v19, 0.0 }
 0x136   : > { %v644_v60 = vpop.f32.mrf.mxu0 }
 0x137   : > { %v709_v61 = vpop.f32.mrf.mxu1  ;;  %v645_v11 = vadd.f32 %v644_v60, %v1926_v36  ;;  %v2026_v60 = vpop.permute.xlu2 %838 }
 0x138   : > { %v710_v12 = vadd.f32 %v709_v61, %v1926_v36  ;;  %v636_v36 = vadd.f32 %v635_v55, %v1950_v48  ;;  %v778_v55 = vpack.c.bf16 %v740_v44, %v738_v50 }
 0x139   : > { %v745_v24 = vmax.f32 %v645_v11, 0.0 }
 0x13a   : > { %v746_v26 = vmax.f32 %v710_v12, 0.0 }
 0x13e   : > { %v647_v0 = vpop.f32.mrf.mxu0 }
 0x13f   : > { %v712_v40 = vpop.f32.mrf.mxu1  ;;  %v648_v7 = vadd.f32 %v647_v0, %v1943_v42 }
 0x140   : > { %v713_v8 = vadd.f32 %v712_v40, %v1943_v42  ;;  %v2032_v40 = vpop.permute.xlu2 %853 }
 0x141   : > { %v747_v20 = vmax.f32 %v648_v7, 0.0 }
 0x142   : > { %v748_v21 = vmax.f32 %v713_v8, 0.0 }
 0x143   : > { %v781_v38 = vpack.c.bf16 %v747_v20, %v745_v24 }
 0x146   : > { %v650_v1 = vpop.f32.mrf.mxu0 }
 0x147   : > { %v715_v2 = vpop.f32.mrf.mxu1  ;;  %v651_v3 = vadd.f32 %v650_v1, %v1892_v25 }
 0x148   : > { %v716_v4 = vadd.f32 %v715_v2, %v1892_v25  ;;  %v642_v25 = vadd.f32 %v641_v58, %v1914_v32  ;;  %v782_v32 = vpack.c.bf16 %v748_v21, %v746_v26 }
 0x149   : > { %v749_v15 = vmax.f32 %v651_v3, 0.0 }
 0x14a   : > { %v750_v16 = vmax.f32 %v716_v4, 0.0  ;;  %v743_v33 = vmax.f32 %v642_v25, 0.0 }
 0x14c   : > { %v779_v46 = vpack.c.bf16 %v743_v33, %v741_v43 }
 0x14e   : > { %v653_v5 = vpop.f32.mrf.mxu0 }
 0x14f   : > { %v718_v6 = vpop.f32.mrf.mxu1  ;;  %v654_v9 = vadd.f32 %v653_v5, %v1904_v29  ;;  %v2038_v5 = vpop.permute.xlu2 %868 }
 0x150   : > { %v719_v10 = vadd.f32 %v718_v6, %v1904_v29  ;;  %v704_v29 = vadd.f32 %v703_v37, %v1902_v28  ;;  %v739_v28 = vmax.f32 %v636_v36, 0.0  ;;  %v1438_v37 = vld [vmem:[%s2099_s3 + $0x38] sm:$0xff] }
 0x151   : > { %v751_v17 = vmax.f32 %v654_v9, 0.0 }
 0x152   : > { %v752_v18 = vmax.f32 %v719_v10, 0.0  ;;  %v742_v45 = vmax.f32 %v704_v29, 0.0  ;;  %v777_v48 = vpack.c.bf16 %v739_v28, %v737_v49 }
 0x153   : > { %v783_v22 = vpack.c.bf16 %v751_v17, %v749_v15 }
 0x154   : > { %v784_v42 = vpack.c.bf16 %v752_v18, %v750_v16  ;;  %v780_v47 = vpack.c.bf16 %v744_v35, %v742_v45 }
 0x155   : > { %929 = vmatpush.bf16.msra.mxu2 %v783_v22 }
 0x156   : > { %978 = vmatpush.bf16.msra.mxu3 %v784_v42 }
 0x157   : > { %v1078_v19 = vpop.permute.xlu2 %1077 }
 0x159   : > { %930 = vmatpush.bf16.msra.mxu2 %v781_v38 }
 0x15a   : > { %979 = vmatpush.bf16.msra.mxu3 %v782_v32 }
 0x15d   : > { %931 = vmatpush.bf16.msra.mxu2 %v779_v46 }
 0x15e   : > { %980 = vmatpush.bf16.msra.mxu3 %v780_v47 }
 0x15f   : > { %v1093_v50 = vpop.permute.xlu2 %1092 }
 0x161   : > { %932 = vmatpush.bf16.msra.mxu2 %v777_v48 }
 0x162   : > { %981 = vmatpush.bf16.msra.mxu3 %v778_v55 }
 0x165   : > { %933 = vmatpush.bf16.msra.mxu2 %v1968_v51  ;;  %v1437_v51 = vld [vmem:[%s2099_s3 + $0x30] sm:$0xff] }
 0x166   : > { %982 = vmatpush.bf16.msra.mxu3 %v1970_v52  ;;  %v814_v52 = vpop.permute.xlu0 %813 }
 0x169   : > { %934 = vmatpush.bf16.msra.mxu2 %v1960_v30  ;;  %v1432_v30 = vld [vmem:[%s2099_s3 + $0x8] sm:$0xff] }
 0x16a   : > { %983 = vmatpush.bf16.msra.mxu3 %v1962_v31  ;;  %v804_v31 = vpop.permute.xlu1 %803 }
 0x16d   : > { %935 = vmatpush.bf16.msra.mxu2 %v1956_v13  ;;  %v1433_v13 = vld [vmem:[%s2099_s3 + $0x10] sm:$0xff] }
 0x16e   : > { %984 = vmatpush.bf16.msra.mxu3 %v1958_v14  ;;  %v1436_v14 = vld [vmem:[%s2099_s3 + $0x28] sm:$0xff]  ;;  %v2017_v56 = vpop.permute.xlu0 %828 }
 0x171   : > { %936 = vmatpush.bf16.msra.mxu2 %v1952_v62  ;;  %v1434_v62 = vld [vmem:[%s2099_s3 + $0x18] sm:$0xff] }
 0x172   : > { %985 = vmatpush.bf16.msra.mxu3 %v1954_v63  ;;  %v1435_v63 = vld [vmem:[%s2099_s3 + $0x20] sm:$0xff]  ;;  %v819_v54 = vpop.permute.xlu1 %818 }
 0x174   : > { %937 = vmatmul.bf16.vlgmr.msra.gmra.mxu2 %v1431_v34 }
 0x175   : > { %986 = vmatmul.bf16.vlgmr.msra.gmra.mxu3 %v1431_v34 }
 0x176   : > { %v2024_v59 = vpop.permute.xlu0 %843 }
 0x17a   : > { %v2022_v58 = vpop.permute.xlu1 %833 }
 0x17e   : > { %v2030_v0 = vpop.permute.xlu0 %858 }
 0x182   : > { %v2028_v61 = vpop.permute.xlu1 %848 }
 0x184   : > { %942 = vmatmul.bf16.gmra.mxu2 %v1432_v30 }
 0x185   : > { %991 = vmatmul.bf16.gmra.mxu3 %v1432_v30 }
 0x186   : > { %v2036_v4 = vpop.permute.xlu0 %873 }
 0x18a   : > { %v2034_v1 = vpop.permute.xlu1 %863 }
 0x18e   : > { %v1083_v25 = vpop.permute.xlu0 %1082 }
 0x192   : > { %v2040_v16 = vpop.permute.xlu1 %878 }
 0x194   : > { %947 = vmatmul.bf16.gmra.mxu2 %v1433_v13 }
 0x195   : > { %996 = vmatmul.bf16.gmra.mxu3 %v1433_v13 }
 0x19a   : > { %v1088_v38 = vpop.permute.xlu1 %1087 }
 0x1a4   : > { %952 = vmatmul.bf16.gmra.mxu2 %v1434_v62 }
 0x1a5   : > { %1001 = vmatmul.bf16.gmra.mxu3 %v1434_v62 }
 0x1b4   : > { %957 = vmatmul.bf16.gmra.mxu2 %v1435_v63 }
 0x1b5   : > { %1006 = vmatmul.bf16.gmra.mxu3 %v1435_v63 }
 0x1c4   : > { %962 = vmatmul.bf16.gmra.mxu2 %v1436_v14 }
 0x1c5   : > { %1011 = vmatmul.bf16.gmra.mxu3 %v1436_v14 }
 0x1d4   : > { %967 = vmatmul.bf16.gmra.mxu2 %v1437_v51 }
 0x1d5   : > { %1016 = vmatmul.bf16.gmra.mxu3 %v1437_v51 }
 0x1e4   : > { %972 = vmatmul.bf16.gmra.mxu2 %v1438_v37 }
 0x1e5   : > { %1021 = vmatmul.bf16.gmra.mxu3 %v1438_v37 }
 0x1f7   : > { %v938_v2 = vpop.f32.mrf.mxu2 }
 0x1f8   : > { %v987_v3 = vpop.f32.mrf.mxu3  ;;  %v939_v6 = vadd.f32 %v938_v2, %v804_v31 }
 0x1f9   : > { %v988_v7 = vadd.f32 %v987_v3, %v804_v31 }
 0x1fa   : > { %v1027_v10 = vmax.f32 %v939_v6, 0.0 }
 0x1fb   : > { %v1028_v11 = vmax.f32 %v988_v7, 0.0 }
 0x1fc   : > { %v1155_v20 = vmul.f32 %v1078_v19, %v1027_v10 }
 0x1fd   : > { %v1156_v21 = vmul.f32 %v1078_v19, %v1028_v11 }
 0x1ff   : > { %v940_v8 = vpop.f32.mrf.mxu2 }
 0x200   : > { %v989_v9 = vpop.f32.mrf.mxu3  ;;  %v941_v12 = vadd.f32 %v940_v8, %v809_v53 }
 0x201   : > { %v990_v15 = vadd.f32 %v989_v9, %v809_v53 }
 0x202   : > { %v1029_v17 = vmax.f32 %v941_v12, 0.0 }
 0x203   : > { %v1030_v18 = vmax.f32 %v990_v15, 0.0 }
 0x204   : > { %v1157_v22 = vmul.f32 %v1083_v25, %v1029_v17 }
 0x205   : > { %v1158_v42 = vmul.f32 %v1083_v25, %v1030_v18 }
 0x206   : > { %v1187_v23 = vadd.f32 %v1157_v22, %v1155_v20  ;;  %v1103_v20 = vpop.permute.xlu1 %1102 }
 0x207   : > { %v1208_v29 = vadd.f32 %v1158_v42, %v1156_v21  ;;  %v943_v24 = vpop.f32.mrf.mxu2  ;;  %v1108_v21 = vpop.permute.xlu2 %1107 }
 0x208   : > { %v992_v26 = vpop.f32.mrf.mxu3  ;;  %v944_v36 = vadd.f32 %v943_v24, %v814_v52 }
 0x209   : > { %v993_v27 = vadd.f32 %v992_v26, %v814_v52  ;;  %v1098_v52 = vpop.permute.xlu0 %1097 }
 0x20a   : > { %v1031_v33 = vmax.f32 %v944_v36, 0.0 }
 0x20b   : > { %v1032_v35 = vmax.f32 %v993_v27, 0.0 }
 0x20c   : > { %v1159_v32 = vmul.f32 %v1088_v38, %v1031_v33 }
 0x20d   : > { %v1160_v39 = vmul.f32 %v1088_v38, %v1032_v35 }
 0x20e   : > { %v1188_v41 = vadd.f32 %v1187_v23, %v1159_v32  ;;  %v1118_v32 = vpop.permute.xlu1 %1117 }
 0x20f   : > { %v1209_v43 = vadd.f32 %v1208_v29, %v1160_v39  ;;  %v945_v45 = vpop.f32.mrf.mxu2 }
 0x210   : > { %v994_v28 = vpop.f32.mrf.mxu3  ;;  %v946_v44 = vadd.f32 %v945_v45, %v819_v54 }
 0x211   : > { %v995_v46 = vadd.f32 %v994_v28, %v819_v54  ;;  %v1113_v38 = vpop.permute.xlu0 %1112 }
 0x212   : > { %v1033_v47 = vmax.f32 %v946_v44, 0.0 }
 0x213   : > { %v1034_v49 = vmax.f32 %v995_v46, 0.0 }
 0x214   : > { %v1161_v48 = vmul.f32 %v1093_v50, %v1033_v47 }
 0x215   : > { %v1162_v55 = vmul.f32 %v1093_v50, %v1034_v49  ;;  %v1123_v49 = vpop.permute.xlu2 %1122 }
 0x216   : > { %v1189_v34 = vadd.f32 %v1188_v41, %v1161_v48 }
 0x217   : > { %v1210_v30 = vadd.f32 %v1209_v43, %v1162_v55  ;;  %v948_v13 = vpop.f32.mrf.mxu2 }
 0x218   : > { %v997_v62 = vpop.f32.mrf.mxu3  ;;  %v949_v63 = vadd.f32 %v948_v13, %v824_v57 }
 0x219   : > { %v998_v14 = vadd.f32 %v997_v62, %v824_v57 }
 0x21a   : > { %v1035_v31 = vmax.f32 %v949_v63, 0.0 }
 0x21b   : > { %v1036_v51 = vmax.f32 %v998_v14, 0.0 }
 0x21c   : > { %v1163_v53 = vmul.f32 %v1098_v52, %v1035_v31 }
 0x21d   : > { %v1164_v37 = vmul.f32 %v1098_v52, %v1036_v51 }
 0x21e   : > { %v1190_v2 = vadd.f32 %v1189_v34, %v1163_v53 }
 0x21f   : > { %v1211_v3 = vadd.f32 %v1210_v30, %v1164_v37  ;;  %v950_v6 = vpop.f32.mrf.mxu2 }
 0x220   : > { %v999_v54 = vpop.f32.mrf.mxu3  ;;  %v951_v22 = vadd.f32 %v950_v6, %v2017_v56 }
 0x221   : > { %v1000_v42 = vadd.f32 %v999_v54, %v2017_v56 }
 0x222   : > { %v1037_v36 = vmax.f32 %v951_v22, 0.0 }
 0x223   : > { %v1038_v27 = vmax.f32 %v1000_v42, 0.0 }
 0x224   : > { %v1165_v45 = vmul.f32 %v1103_v20, %v1037_v36  ;;  %v1138_v36 = vpop.permute.xlu2 %1137 }
 0x225   : > { %v1166_v28 = vmul.f32 %v1103_v20, %v1038_v27 }
 0x227   : > { %v953_v7 = vpop.f32.mrf.mxu2  ;;  %v1212_v63 = vadd.f32 %v1211_v3, %v1166_v28  ;;  %v1133_v3 = vpop.permute.xlu1 %1132 }
 0x228   : > { %v1002_v8 = vpop.f32.mrf.mxu3  ;;  %v954_v23 = vadd.f32 %v953_v7, %v2022_v58 }
 0x229   : > { %v1003_v29 = vadd.f32 %v1002_v8, %v2022_v58  ;;  %v1128_v8 = vpop.permute.xlu0 %1127 }
 0x22a   : > { %v1039_v39 = vmax.f32 %v954_v23, 0.0 }
 0x22b   : > { %v1040_v41 = vmax.f32 %v1003_v29, 0.0 }
 0x22c   : > { %v1167_v50 = vmul.f32 %v1108_v21, %v1039_v39 }
 0x22d   : > { %v1168_v48 = vmul.f32 %v1108_v21, %v1040_v41 }
 0x22f   : > { %v955_v9 = vpop.f32.mrf.mxu2  ;;  %v1213_v6 = vadd.f32 %v1212_v63, %v1168_v48 }
 0x230   : > { %v1004_v10 = vpop.f32.mrf.mxu3  ;;  %v956_v33 = vadd.f32 %v955_v9, %v2026_v60 }
 0x231   : > { %v1005_v35 = vadd.f32 %v1004_v10, %v2026_v60 }
 0x232   : > { %v1041_v44 = vmax.f32 %v956_v33, 0.0 }
 0x233   : > { %v1042_v58 = vmax.f32 %v1005_v35, 0.0 }
 0x234   : > { %v1169_v14 = vmul.f32 %v1113_v38, %v1041_v44  ;;  %v1143_v44 = vpop.permute.xlu0 %1142 }
 0x235   : > { %v1170_v31 = vmul.f32 %v1113_v38, %v1042_v58 }
 0x237   : > { %v958_v11 = vpop.f32.mrf.mxu2 }
 0x238   : > { %v1007_v12 = vpop.f32.mrf.mxu3  ;;  %v959_v43 = vadd.f32 %v958_v11, %v2024_v59 }
 0x239   : > { %v1008_v56 = vadd.f32 %v1007_v12, %v2024_v59  ;;  %v1191_v59 = vadd.f32 %v1190_v2, %v1165_v45  ;;  %v1214_v12 = vadd.f32 %v1213_v6, %v1170_v31 }
 0x23a   : > { %v1043_v60 = vmax.f32 %v959_v43, 0.0 }
 0x23b   : > { %v1044_v55 = vmax.f32 %v1008_v56, 0.0  ;;  %v1192_v37 = vadd.f32 %v1191_v59, %v1167_v50 }
 0x23c   : > { %v1171_v54 = vmul.f32 %v1118_v32, %v1043_v60 }
 0x23d   : > { %v1172_v7 = vmul.f32 %v1118_v32, %v1044_v55  ;;  %v1193_v11 = vadd.f32 %v1192_v37, %v1169_v14 }
 0x23f   : > { %v960_v15 = vpop.f32.mrf.mxu2 }
 0x240   : > { %v1009_v17 = vpop.f32.mrf.mxu3  ;;  %v961_v46 = vadd.f32 %v960_v15, %v2028_v61 }
 0x241   : > { %v1010_v47 = vadd.f32 %v1009_v17, %v2028_v61 }
 0x242   : > { %v1045_v51 = vmax.f32 %v961_v46, 0.0 }
 0x243   : > { %v1046_v52 = vmax.f32 %v1010_v47, 0.0  ;;  %v1148_v47 = vpop.permute.xlu1 %1147 }
 0x244   : > { %v1173_v15 = vmul.f32 %v1123_v49, %v1045_v51  ;;  %v1153_v51 = vpop.permute.xlu2 %1152 }
 0x245   : > { %v1174_v17 = vmul.f32 %v1123_v49, %v1046_v52 }
 0x247   : > { %v963_v18 = vpop.f32.mrf.mxu2 }
 0x248   : > { %v1012_v25 = vpop.f32.mrf.mxu3  ;;  %v964_v34 = vadd.f32 %v963_v18, %v2032_v40 }
 0x249   : > { %v1013_v30 = vadd.f32 %v1012_v25, %v2032_v40 }
 0x24a   : > { %v1047_v9 = vmax.f32 %v964_v34, 0.0 }
 0x24b   : > { %v1048_v10 = vmax.f32 %v1013_v30, 0.0 }
 0x24c   : > { %v1175_v21 = vmul.f32 %v1128_v8, %v1047_v9 }
 0x24d   : > { %v1176_v22 = vmul.f32 %v1128_v8, %v1048_v10 }
 0x24f   : > { %v965_v57 = vpop.f32.mrf.mxu2 }
 0x250   : > { %v1014_v19 = vpop.f32.mrf.mxu3  ;;  %v966_v53 = vadd.f32 %v965_v57, %v2030_v0  ;;  %v1194_v57 = vadd.f32 %v1193_v11, %v1171_v54  ;;  %v1233_v11 = vpop.permute.xlu0 %1232 }
 0x251   : > { %v1015_v61 = vadd.f32 %v1014_v19, %v2030_v0  ;;  %v1215_v0 = vadd.f32 %v1214_v12, %v1172_v7 }
 0x252   : > { %v1049_v18 = vmax.f32 %v966_v53, 0.0  ;;  %v1195_v27 = vadd.f32 %v1194_v57, %v1173_v15  ;;  %v1244_v57 = vlaneseq }
 0x253   : > { %v1050_v25 = vmax.f32 %v1015_v61, 0.0  ;;  %v1216_v33 = vadd.f32 %v1215_v0, %v1174_v17  ;;  %v1235_v17 = vperm.slane %v1233_v11, 0 }
 0x254   : > { %v1177_v35 = vmul.f32 %v1133_v3, %v1049_v18  ;;  %v1196_v41 = vadd.f32 %v1195_v27, %v1175_v21  ;;  %vm1246_vm2 = vcmp.lt.s32.totalorder %v1244_v57, 256 }
 0x255   : > { %v1178_v38 = vmul.f32 %v1133_v3, %v1050_v25  ;;  %v1217_v43 = vadd.f32 %v1216_v33, %v1176_v22 }
 0x256   : > { %v1197_v58 = vadd.f32 %v1196_v41, %v1177_v35 }
 0x257   : > { %v968_v24 = vpop.f32.mrf.mxu2  ;;  %v1218_v46 = vadd.f32 %v1217_v43, %v1178_v38 }
 0x258   : > { %v1017_v26 = vpop.f32.mrf.mxu3  ;;  %v969_v40 = vadd.f32 %v968_v24, %v2034_v1 }
 0x259   : > { %v1018_v2 = vadd.f32 %v1017_v26, %v2034_v1 }
 0x25a   : > { %v1051_v42 = vmax.f32 %v969_v40, 0.0 }
 0x25b   : > { %v1052_v23 = vmax.f32 %v1018_v2, 0.0 }
 0x25d   : > { %v1180_v56 = vmul.f32 %v1138_v36, %v1052_v23 }
 0x25f   : > { %v970_v13 = vpop.f32.mrf.mxu2  ;;  %v1219_v48 = vadd.f32 %v1218_v46, %v1180_v56 }
 0x260   : > { %v1019_v62 = vpop.f32.mrf.mxu3  ;;  %v971_v19 = vadd.f32 %v970_v13, %v2038_v5 }
 0x261   : > { %v1020_v20 = vadd.f32 %v1019_v62, %v2038_v5  ;;  %v1179_v5 = vmul.f32 %v1138_v36, %v1051_v42 }
 0x262   : > { %v1053_v32 = vmax.f32 %v971_v19, 0.0 }
 0x263   : > { %v1054_v39 = vmax.f32 %v1020_v20, 0.0 }
 0x264   : > { %v1181_v49 = vmul.f32 %v1143_v44, %v1053_v32 }
 0x265   : > { %v1182_v50 = vmul.f32 %v1143_v44, %v1054_v39 }
 0x267   : > { %v973_v29 = vpop.f32.mrf.mxu2  ;;  %v1220_v63 = vadd.f32 %v1219_v48, %v1182_v50 }
 0x268   : > { %v1022_v24 = vpop.f32.mrf.mxu3  ;;  %v974_v1 = vadd.f32 %v973_v29, %v2036_v4 }
 0x269   : > { %v1023_v26 = vadd.f32 %v1022_v24, %v2036_v4  ;;  %v1198_v4 = vadd.f32 %v1197_v58, %v1179_v5 }
 0x26a   : > { %v1055_v45 = vmax.f32 %v974_v1, 0.0 }
 0x26b   : > { %v1056_v28 = vmax.f32 %v1023_v26, 0.0  ;;  %v1199_v59 = vadd.f32 %v1198_v4, %v1181_v49 }
 0x26c   : > { %v1183_v34 = vmul.f32 %v1148_v47, %v1055_v45 }
 0x26d   : > { %v1184_v30 = vmul.f32 %v1148_v47, %v1056_v28 }
 0x26e   : > { %v1200_v52 = vadd.f32 %v1199_v59, %v1183_v34 }
 0x26f   : > { %v975_v60 = vpop.f32.mrf.mxu2  ;;  %v1221_v53 = vadd.f32 %v1220_v63, %v1184_v30 }
 0x270   : > { %v1024_v55 = vpop.f32.mrf.mxu3  ;;  %v976_v13 = vadd.f32 %v975_v60, %v2040_v16 }
 0x271   : > { %v1025_v62 = vadd.f32 %v1024_v55, %v2040_v16 }
 0x272   : > { %v1057_v14 = vmax.f32 %v976_v13, 0.0 }
 0x273   : > { %v1058_v31 = vmax.f32 %v1025_v62, 0.0 }
 0x274   : > { %v1185_v61 = vmul.f32 %v1153_v51, %v1057_v14 }
 0x275   : > { %v1186_v37 = vmul.f32 %v1153_v51, %v1058_v31 }
 0x276   : > { %v1201_v6 = vadd.f32 %v1200_v52, %v1185_v61 }
 0x277   : > { %v1222_v54 = vadd.f32 %v1221_v53, %v1186_v37 }
 0x278   : > { %v1202_v7 = vrot.slane %v1201_v6, 4 }
 0x279   : > { %v1223_v8 = vrot.slane %v1222_v54, 4 }
 0x27a   : > { %v1203_v9 = vadd.f32 %v1202_v7, %v1201_v6 }
 0x27b   : > { %v1224_v10 = vadd.f32 %v1223_v8, %v1222_v54 }
 0x27c   : > { %v1204_v40 = vrot.slane %v1203_v9, 2 }
 0x27d   : > { %v1225_v16 = vrot.slane %v1224_v10, 2 }
 0x27e   : > { %v1205_v2 = vadd.f32 %v1204_v40, %v1203_v9 }
 0x27f   : > { %v1226_v3 = vadd.f32 %v1225_v16, %v1224_v10 }
 0x280   : > { %v1206_v12 = vrot.slane %v1205_v2, 1 }
 0x281   : > { %v1227_v15 = vrot.slane %v1226_v3, 1 }
 0x282   : > { %v1207_v18 = vadd.f32 %v1206_v12, %v1205_v2 }
 0x283   : > { %v1228_v25 = vadd.f32 %v1227_v15, %v1226_v3 }
 0x284   : > { %v1236_v19 = vadd.f32 %v1235_v17, %v1207_v18 }
 0x285   : > { %v1237_v0 = vadd.f32 %v1235_v17, %v1228_v25 }
 0x287   : > { %v1240_v20 = vrot.slane %v1237_v0, 7 }
 0x289   : > { %v1242_v21 = vsel %vm1241_vm1, %v1236_v19, %v1240_v20 }
 0x28a   : > { %1248 = vst.msk [vmem:[%s286_s21] sm:$0x3] %vm1246_vm2, %v1242_v21 }
 0x28b   : > { %1509 = shalt.err (!%p1506_p3)
}
 0x28c   : > { %1439 = dma.vmem_to_hbm [thread:$0]  (%p1628_p5), %s1263_s22, 32, %s1265_s23, %s1250_s6  }
 0x28d PF: > { %p1445_p4 = scmp.ge.s32.totalorder %s1544_s29, 2  ;;  %s1276_s14 = sand.u32 1, %s1532_s26  }
 0x28e   : > { %s1277_s16 = scalar_lea.sflag [#allocation4], %s1276_s14 }
 0x28f   : > { %p1442_p7 = pnand %p1445_p4, %p1632_p6 }
 0x291   : > { %p1443_p8 = pneg %p1442_p7 }
 0x293   : > { %1527 = dma.done.wait (%p1443_p8), %s1277_s16, 32  }
 0x294   : > { %1529 = vsyncadd (%p1443_p8), %s1277_s16, 4294967264  ;;  %p19_p9 = scmp.ge.s32.totalorder %s1615_s8, 4   ;;  %s2106_s26 = smov %s1536_s27 }
 0x295   : > { %s2107_s27 = smov %s1540_s28  ;;  %s2108_s28 = smov %s1626_s11 }
 0x296   : > { %s2109_s29 = smov %s1615_s8  ;;  %21 = sbr.rel (!%p19_p9) target bundleno = 6 (0x6), region = 83 }
 0x29b   :  { %1283 = vsyncpa [#allocation4], 1 }
 0x29c   :  { %1285 = vsyncpa [#allocation4 + $0x1], 1 }

</bundles_post_ra>
